<compile_context>
chip_gen: v7x
topology: tpu7x:2x2x1
jax: 0.10.0
libtpu: 0.0.40
codegen_flags: <defaults>
</compile_context>

<pallas_src>
import functools

import jax
import jax.numpy as jnp
from jax.experimental import pallas as pl
from jax.experimental.pallas import tpu as pltpu


LANE = 128
BATCH_ALIGN = 16          # bf16 packs 2 rows per sublane -> 16-aligned batch tiles


def _round_up(x, m):
    return (x + m - 1) // m * m


def _cdiv(a, b):
    return -(-a // b)


# ------------------------------ fused kernel --------------------------------

def _fused_kernel(bias_slices, x_ref, wb_ref, b_ref, *refs):
    """(GAP + backbone proj) matmul -> chained (Linear -> ReLU -> Linear) heads.

    refs = (w1, w2) per head (bf16, lane-padded), then the single packed output.
      x_ref  : (TB, C*HW_pad)       bf16   (GAP is folded into wb_ref)
      wb_ref : (C*HW_pad, F_pad)    bf16   (= repeat(wb, HW, axis=0) / HW, padded)
      b_ref  : (1, total_bias_pad)  f32    (all biases packed, 128-aligned segs)
      out    : (TB, total_cls_pad)  f32    (all taxon outputs packed)
    Zero padding of every feature / hidden / class dim keeps the math exact.
    """
    n_heads = (len(refs) - 1) // 2
    w_refs = refs[: 2 * n_heads]
    out_ref = refs[2 * n_heads]

    def bias(idx):
        s, l = bias_slices[idx]          # static, 128-aligned
        return b_ref[:, s:s + l]         # (1, l)

    # Backbone: single lane-dense MXU matmul, f32 accumulation.
    act = jnp.dot(x_ref[...], wb_ref[...],
                  preferred_element_type=jnp.float32) + bias(0)

    outs = []
    for h in range(n_heads):
        w1 = w_refs[2 * h][...]
        w2 = w_refs[2 * h + 1][...]
        hid = jnp.maximum(
            jnp.dot(act.astype(jnp.bfloat16), w1,
                    preferred_element_type=jnp.float32) + bias(1 + 2 * h),
            0.0)
        act = jnp.dot(hid.astype(jnp.bfloat16), w2,
                      preferred_element_type=jnp.float32) + bias(2 + 2 * h)
        outs.append(act)

    # One wide, lane-dense, unmasked store for all taxa.
    out_ref[...] = outs[0] if n_heads == 1 else jnp.concatenate(outs, axis=-1)


# ------------------------------ wrapper --------------------------------------

def hidden_layer_model_forward(x, backbone_params, head_params, *,
                               max_batch_tile=1024):
    """Mirrors HiddenLayerModel.forward: returns a list of per-taxon outputs."""
    n, c, hh, ww = x.shape
    hw = hh * ww
    k = c * hw
    k_pad = _round_up(k, LANE)

    # ---- input: fold GAP into the backbone matmul (lane-dense, K = C*HW) ----
    x2 = x.reshape(n, k).astype(jnp.bfloat16)        # bf16 halves the HBM stream

    # ---- params: zero-pad to lane multiples (exact), cast weights to bf16 ----
    def pad2(a, rows, cols):
        return jnp.pad(a, ((0, rows - a.shape[0]), (0, cols - a.shape[1])))

    wb, bb = backbone_params
    f_pad = _round_up(wb.shape[1], LANE)
    # Row c*hw + s of the expanded weight is wb[c, :] / hw  =>  dot == GAP+proj.
    wb_exp = jnp.repeat(wb.astype(jnp.float32) / hw, hw, axis=0)
    wb_exp = pad2(wb_exp, k_pad, f_pad).astype(jnp.bfloat16)

    weights = []            # bf16, lane-padded, VMEM-resident
    bias_segs = []          # f32 (1, pad) segments
    bias_slices = []        # static (start, len) into the packed bias row
    out_slices = []         # static (start, len) into the packed output
    n_classes = []

    def add_bias(b, pad):
        start = sum(seg.shape[1] for seg in bias_segs)
        bias_segs.append(pad2(b.reshape(1, -1).astype(jnp.float32), 1, pad))
        bias_slices.append((start, pad))

    add_bias(bb, f_pad)

    in_pad = f_pad
    out_off = 0
    for (w1, b1, w2, b2) in head_params:
        hid_pad = _round_up(w1.shape[1], LANE)
        cls_pad = _round_up(w2.shape[1], LANE)
        weights.append(pad2(w1.astype(jnp.float32), in_pad, hid_pad)
                       .astype(jnp.bfloat16))
        weights.append(pad2(w2.astype(jnp.float32), hid_pad, cls_pad)
                       .astype(jnp.bfloat16))
        add_bias(b1, hid_pad)
        add_bias(b2, cls_pad)
        out_slices.append((out_off, cls_pad))
        out_off += cls_pad
        n_classes.append(w2.shape[1])
        in_pad = cls_pad
    total_out = out_off
    bias_packed = jnp.concatenate(bias_segs, axis=1)     # (1, total_bias_pad)

    # ---- explicit VMEM buffer plan & budget-driven batch tile --------------
    try:
        vmem_cap = int(pltpu.get_tpu_info().vmem_capacity_bytes)
    except Exception:
        vmem_cap = 64 << 20                               # v7x-safe fallback
    budget = int(0.80 * vmem_cap)                         # compiler headroom
    # Plan: 2x input tile + 2x output tile (pipeline double-buffers) +
    # 2x resident params (constant index_map still gets 2 buffers) + 25% slack.
    param_bytes = (int(wb_exp.size) * 2
                   + sum(int(w.size) * 2 for w in weights)
                   + 8 * bias_packed.shape[1] * 4)        # (1,K) pads to 8 sublanes
    per_row_bytes = 2 * k_pad * 2 + 2 * total_out * 4
    avail = budget / 1.25 - 2 * param_bytes
    tb_max = int(avail // per_row_bytes) if avail > 0 else BATCH_ALIGN
    tb_max = max(BATCH_ALIGN, (tb_max // BATCH_ALIGN) * BATCH_ALIGN)
    tb_max = min(tb_max, max_batch_tile)

    if n <= tb_max:
        # >= 2 grid steps so the "parallel" axis can use both v7x TensorCores.
        tb = max(BATCH_ALIGN, _round_up(_cdiv(n, 2), BATCH_ALIGN))
        steps = 2
    else:
        tb = tb_max
        steps = _cdiv(n, tb)
    n_pad = steps * tb

    if n_pad != n or k_pad != k:
        x2 = jnp.pad(x2, ((0, n_pad - n), (0, k_pad - k)))

    plan_bytes = int(1.25 * (2 * param_bytes + tb * per_row_bytes))
    vmem_limit = int(min(max(plan_bytes, 32 << 20), budget))

    # ---- specs -------------------------------------------------------------
    x_spec = pl.BlockSpec((tb, k_pad), lambda i: (i, 0))
    # Whole-array params with a constant block index stay VMEM-resident.
    param_arrays = [wb_exp, bias_packed] + weights
    param_specs = [pl.BlockSpec(p.shape, lambda i: (0, 0)) for p in param_arrays]
    out_spec = pl.BlockSpec((tb, total_out), lambda i: (i, 0))
    out_shape = jax.ShapeDtypeStruct((n_pad, total_out), jnp.float32)

    kernel = functools.partial(_fused_kernel, tuple(bias_slices))

    packed = pl.pallas_call(
        kernel,
        out_shape=out_shape,
        grid=(steps,),
        in_specs=[x_spec] + param_specs,
        out_specs=out_spec,
        compiler_params=pltpu.CompilerParams(
            dimension_semantics=("parallel",),   # batch shards across TCs (v7x)
            vmem_limit_bytes=vmem_limit,
        ),
    )(x2, *param_arrays)

    # Unpack per-taxon outputs; slice away batch / lane padding.
    return [packed[:n, s:s + nc] for (s, _), nc in zip(out_slices, n_classes)]


# ------------------------------ parameter init -------------------------------

def _linear_init(key, fan_in, fan_out):
    """Deterministic PyTorch-style uniform(-1/sqrt(fan_in), 1/sqrt(fan_in))."""
    kw, kb = jax.random.split(key)
    bound = 1.0 / jnp.sqrt(jnp.float32(fan_in))
    w = jax.random.uniform(kw, (fan_in, fan_out), jnp.float32, -bound, bound)
    b = jax.random.uniform(kb, (1, fan_out), jnp.float32, -bound, bound)
    return w, b


if __name__ == "__main__":
    # Small shapes consistent with the module's forward.
    N, C, H, W = 2, 4, 16, 16
    in_features = 32                        # model.fc.in_features
    classes_per_taxon = (10, 6)
    hidden_features_per_taxon = (16, 8)

    root = jax.random.PRNGKey(0)
    k_x, k_bb, k_heads = jax.random.split(root, 3)

    x = jax.random.normal(k_x, (N, C, H, W), jnp.float32)

    # Backbone: GAP + Linear(C, in_features); model.fc = Identity.
    backbone_params = _linear_init(k_bb, C, in_features)

    # Chained heads: Linear(in, hidden) -> ReLU -> Linear(hidden, classes).
    head_params = []
    feat_in = in_features
    keys = jax.random.split(k_heads, len(classes_per_taxon))
    for kk, hidden, n_cls in zip(keys, hidden_features_per_taxon,
                                 classes_per_taxon):
        k1, k2 = jax.random.split(kk)
        w1, b1 = _linear_init(k1, feat_in, hidden)
        w2, b2 = _linear_init(k2, hidden, n_cls)
        head_params.append((w1, b1, w2, b2))
        feat_in = n_cls

    # Run the fused Pallas forward.
    outputs = hidden_layer_model_forward(x, backbone_params, head_params)
    outputs = [jax.block_until_ready(o) for o in outputs]

    # --- reference 1: exact module semantics in f32 ---
    wb, bb = backbone_params
    ref32 = jnp.mean(x, axis=(2, 3)) @ wb + bb
    refs32 = []
    for (w1, b1, w2, b2) in head_params:
        ref32 = jnp.maximum(ref32 @ w1 + b1, 0.0) @ w2 + b2
        refs32.append(ref32)

    # --- reference 2: matched precision (same bf16 operands, f32 accum) ---
    hw = H * W
    bf = jnp.bfloat16
    wb_exp_ref = jnp.repeat(wb / hw, hw, axis=0).astype(bf)
    ref = jnp.dot(x.reshape(N, -1).astype(bf), wb_exp_ref,
                  preferred_element_type=jnp.float32) + bb
    refs_bf = []
    for (w1, b1, w2, b2) in head_params:
        hid = jnp.maximum(
            jnp.dot(ref.astype(bf), w1.astype(bf),
                    preferred_element_type=jnp.float32) + b1, 0.0)
        ref = jnp.dot(hid.astype(bf), w2.astype(bf),
                      preferred_element_type=jnp.float32) + b2
        refs_bf.append(ref)

    for got, want_bf, want32, n_cls in zip(outputs, refs_bf, refs32,
                                           classes_per_taxon):
        assert got.shape == (N, n_cls), got.shape
        # Tight: kernel matches the same-precision (bf16 operands, f32 acc) math.
        assert float(jnp.max(jnp.abs(got - want_bf))) < 1e-3
        # Loose: bf16 quantization vs. exact f32 module semantics.
        scale = float(jnp.max(jnp.abs(want32)))
        assert float(jnp.max(jnp.abs(got - want32))) < 5e-2 * max(1.0, scale)

    print("KERNEL_OK")
</pallas_src>

<mosaic_0001>
module attributes {stable_mosaic.version = 11 : i64} {
  func.func @_fused_kernel(%arg0: i32, %arg1: memref<16x1024xbf16, #tpu.memory_space<vmem>>, %arg2: memref<1024x128xbf16, #tpu.memory_space<vmem>>, %arg3: memref<1x640xf32, #tpu.memory_space<vmem>>, %arg4: memref<128x128xbf16, #tpu.memory_space<vmem>>, %arg5: memref<128x128xbf16, #tpu.memory_space<vmem>>, %arg6: memref<128x128xbf16, #tpu.memory_space<vmem>>, %arg7: memref<128x128xbf16, #tpu.memory_space<vmem>>, %arg8: memref<16x256xf32, #tpu.memory_space<vmem>>) attributes {dimension_semantics = [#tpu.dimension_semantics<parallel>], iteration_bounds = array<i64: 2>, scalar_prefetch = 0 : i64, scratch_operands = 0 : i64, tpu.core_type = #tpu.core_type<tc>, window_params = [{transform_indices = @transform_0, window_bounds = array<i64: 16, 1024>}, {pipeline_mode = #tpu.pipeline_mode<synchronous>, transform_indices = @transform_1, window_bounds = array<i64: 1024, 128>}, {pipeline_mode = #tpu.pipeline_mode<synchronous>, transform_indices = @transform_2, window_bounds = array<i64: 1, 640>}, {pipeline_mode = #tpu.pipeline_mode<synchronous>, transform_indices = @transform_3, window_bounds = array<i64: 128, 128>}, {pipeline_mode = #tpu.pipeline_mode<synchronous>, transform_indices = @transform_4, window_bounds = array<i64: 128, 128>}, {pipeline_mode = #tpu.pipeline_mode<synchronous>, transform_indices = @transform_5, window_bounds = array<i64: 128, 128>}, {pipeline_mode = #tpu.pipeline_mode<synchronous>, transform_indices = @transform_6, window_bounds = array<i64: 128, 128>}, {transform_indices = @transform_7, window_bounds = array<i64: 16, 256>}]} {
    %c0 = arith.constant 0 : index
    %c0_0 = arith.constant 0 : index
    %0 = vector.load %arg1[%c0, %c0_0] : memref<16x1024xbf16, #tpu.memory_space<vmem>>, vector<16x1024xbf16>
    %c0_1 = arith.constant 0 : index
    %c0_2 = arith.constant 0 : index
    %1 = vector.load %arg2[%c0_1, %c0_2] : memref<1024x128xbf16, #tpu.memory_space<vmem>>, vector<1024x128xbf16>
    %cst = arith.constant dense<0.000000e+00> : vector<16x128xf32>
    %2 = tpu.matmul %0, %1, %cst {dimension_numbers = #tpu.dot_dimension_numbers<[1], [0], [0], [1], [0, 0, 1, 1], [], []>} : vector<16x1024xbf16>, vector<1024x128xbf16>, vector<16x128xf32> -> vector<16x128xf32>
    %c0_3 = arith.constant 0 : index
    %c0_4 = arith.constant 0 : index
    %3 = vector.load %arg3[%c0_3, %c0_4] : memref<1x640xf32, #tpu.memory_space<vmem>>, vector<1x128xf32>
    %4 = vector.broadcast %3 : vector<1x128xf32> to vector<16x128xf32>
    %5 = arith.addf %2, %4 : vector<16x128xf32>
    %c0_5 = arith.constant 0 : index
    %c0_6 = arith.constant 0 : index
    %6 = vector.load %arg4[%c0_5, %c0_6] : memref<128x128xbf16, #tpu.memory_space<vmem>>, vector<128x128xbf16>
    %c0_7 = arith.constant 0 : index
    %c0_8 = arith.constant 0 : index
    %7 = vector.load %arg5[%c0_7, %c0_8] : memref<128x128xbf16, #tpu.memory_space<vmem>>, vector<128x128xbf16>
    %8 = arith.truncf %5 : vector<16x128xf32> to vector<16x128xbf16>
    %cst_9 = arith.constant dense<0.000000e+00> : vector<16x128xf32>
    %9 = tpu.matmul %8, %6, %cst_9 {dimension_numbers = #tpu.dot_dimension_numbers<[1], [0], [0], [1], [0, 0, 1, 1], [], []>} : vector<16x128xbf16>, vector<128x128xbf16>, vector<16x128xf32> -> vector<16x128xf32>
    %c0_10 = arith.constant 0 : index
    %c128 = arith.constant 128 : index
    %10 = vector.load %arg3[%c0_10, %c128] : memref<1x640xf32, #tpu.memory_space<vmem>>, vector<1x128xf32>
    %11 = vector.broadcast %10 : vector<1x128xf32> to vector<16x128xf32>
    %12 = arith.addf %9, %11 : vector<16x128xf32>
    %cst_11 = arith.constant 0.000000e+00 : f32
    %13 = vector.broadcast %cst_11 : f32 to vector<16x128xf32>
    %14 = arith.maximumf %12, %13 : vector<16x128xf32>
    %15 = arith.truncf %14 : vector<16x128xf32> to vector<16x128xbf16>
    %cst_12 = arith.constant dense<0.000000e+00> : vector<16x128xf32>
    %16 = tpu.matmul %15, %7, %cst_12 {dimension_numbers = #tpu.dot_dimension_numbers<[1], [0], [0], [1], [0, 0, 1, 1], [], []>} : vector<16x128xbf16>, vector<128x128xbf16>, vector<16x128xf32> -> vector<16x128xf32>
    %c0_13 = arith.constant 0 : index
    %c256 = arith.constant 256 : index
    %17 = vector.load %arg3[%c0_13, %c256] : memref<1x640xf32, #tpu.memory_space<vmem>>, vector<1x128xf32>
    %18 = vector.broadcast %17 : vector<1x128xf32> to vector<16x128xf32>
    %19 = arith.addf %16, %18 : vector<16x128xf32>
    %c0_14 = arith.constant 0 : index
    %c0_15 = arith.constant 0 : index
    %20 = vector.load %arg6[%c0_14, %c0_15] : memref<128x128xbf16, #tpu.memory_space<vmem>>, vector<128x128xbf16>
    %c0_16 = arith.constant 0 : index
    %c0_17 = arith.constant 0 : index
    %21 = vector.load %arg7[%c0_16, %c0_17] : memref<128x128xbf16, #tpu.memory_space<vmem>>, vector<128x128xbf16>
    %22 = arith.truncf %19 : vector<16x128xf32> to vector<16x128xbf16>
    %cst_18 = arith.constant dense<0.000000e+00> : vector<16x128xf32>
    %23 = tpu.matmul %22, %20, %cst_18 {dimension_numbers = #tpu.dot_dimension_numbers<[1], [0], [0], [1], [0, 0, 1, 1], [], []>} : vector<16x128xbf16>, vector<128x128xbf16>, vector<16x128xf32> -> vector<16x128xf32>
    %c0_19 = arith.constant 0 : index
    %c384 = arith.constant 384 : index
    %24 = vector.load %arg3[%c0_19, %c384] : memref<1x640xf32, #tpu.memory_space<vmem>>, vector<1x128xf32>
    %25 = vector.broadcast %24 : vector<1x128xf32> to vector<16x128xf32>
    %26 = arith.addf %23, %25 : vector<16x128xf32>
    %cst_20 = arith.constant 0.000000e+00 : f32
    %27 = vector.broadcast %cst_20 : f32 to vector<16x128xf32>
    %28 = arith.maximumf %26, %27 : vector<16x128xf32>
    %29 = arith.truncf %28 : vector<16x128xf32> to vector<16x128xbf16>
    %cst_21 = arith.constant dense<0.000000e+00> : vector<16x128xf32>
    %30 = tpu.matmul %29, %21, %cst_21 {dimension_numbers = #tpu.dot_dimension_numbers<[1], [0], [0], [1], [0, 0, 1, 1], [], []>} : vector<16x128xbf16>, vector<128x128xbf16>, vector<16x128xf32> -> vector<16x128xf32>
    %c0_22 = arith.constant 0 : index
    %c512 = arith.constant 512 : index
    %31 = vector.load %arg3[%c0_22, %c512] : memref<1x640xf32, #tpu.memory_space<vmem>>, vector<1x128xf32>
    %32 = vector.broadcast %31 : vector<1x128xf32> to vector<16x128xf32>
    %33 = arith.addf %30, %32 : vector<16x128xf32>
    %34 = tpu.concatenate %19, %33 in 1 : vector<16x128xf32>, vector<16x128xf32> -> vector<16x256xf32>
    %c0_23 = arith.constant 0 : index
    %c0_24 = arith.constant 0 : index
    %35 = vector.load %arg8[%c0_23, %c0_24] : memref<16x256xf32, #tpu.memory_space<vmem>>, vector<16x256xf32>
    tpu.vector_store %arg8[%c0_23, %c0_24], %34 {strides = array<i32>} : memref<16x256xf32, #tpu.memory_space<vmem>>, vector<16x256xf32>,
    return
  }
  func.func @transform_0(%arg0: i32) -> (i32, i32) {
    %c0_i32 = arith.constant 0 : i32
    %c0_i32_0 = arith.constant 0 : i32
    return %arg0, %c0_i32 : i32, i32
  }
  func.func @transform_1(%arg0: i32) -> (i32, i32) {
    %c0_i32 = arith.constant 0 : i32
    %c0_i32_0 = arith.constant 0 : i32
    %c0_i32_1 = arith.constant 0 : i32
    return %c0_i32, %c0_i32_0 : i32, i32
  }
  func.func @transform_2(%arg0: i32) -> (i32, i32) {
    %c0_i32 = arith.constant 0 : i32
    %c0_i32_0 = arith.constant 0 : i32
    %c0_i32_1 = arith.constant 0 : i32
    return %c0_i32, %c0_i32_0 : i32, i32
  }
  func.func @transform_3(%arg0: i32) -> (i32, i32) {
    %c0_i32 = arith.constant 0 : i32
    %c0_i32_0 = arith.constant 0 : i32
    %c0_i32_1 = arith.constant 0 : i32
    return %c0_i32, %c0_i32_0 : i32, i32
  }
  func.func @transform_4(%arg0: i32) -> (i32, i32) {
    %c0_i32 = arith.constant 0 : i32
    %c0_i32_0 = arith.constant 0 : i32
    %c0_i32_1 = arith.constant 0 : i32
    return %c0_i32, %c0_i32_0 : i32, i32
  }
  func.func @transform_5(%arg0: i32) -> (i32, i32) {
    %c0_i32 = arith.constant 0 : i32
    %c0_i32_0 = arith.constant 0 : i32
    %c0_i32_1 = arith.constant 0 : i32
    return %c0_i32, %c0_i32_0 : i32, i32
  }
  func.func @transform_6(%arg0: i32) -> (i32, i32) {
    %c0_i32 = arith.constant 0 : i32
    %c0_i32_0 = arith.constant 0 : i32
    %c0_i32_1 = arith.constant 0 : i32
    return %c0_i32, %c0_i32_0 : i32, i32
  }
  func.func @transform_7(%arg0: i32) -> (i32, i32) {
    %c0_i32 = arith.constant 0 : i32
    %c0_i32_0 = arith.constant 0 : i32
    return %arg0, %c0_i32 : i32, i32
  }
}

</mosaic_0001>

<bundles_post_ra>
// kernel: tpu_custom_call.1
= control target key start
LH: loop header
LB: loop body
LE: loop exit
PB: predicated region body
PF: predicated region fallthrough
CT: control target
= control target key end

     0   :  { %12 = vsyncpa [#allocation3], 0  ;;  %s2939_s0 = inlined_call_operand.hbm [shape: bf16[32,1024], index: 0, kind: input, shape index: {}]   ;;  %s2940_s1 = inlined_call_operand.hbm [shape: bf16[1024,128], index: 1, kind: input, shape index: {}]   ;;  %s2941_s2 = inlined_call_operand.vmem [shape: f32[1,640], index: 2, kind: input, shape index: {}]   ;;  %s2942_s3 = inlined_call_operand.hbm [shape: bf16[128,128], index: 3, kind: input, shape index: {}]   ;;  %s2943_s4 = inlined_call_operand.hbm [shape: bf16[128,128], index: 4, kind: input, shape index: {}]   ;;  %s2944_s5 = inlined_call_operand.hbm [shape: bf16[128,128], index: 5, kind: input, shape index: {}]   ;;  %s2945_s6 = inlined_call_operand.hbm [shape: bf16[128,128], index: 6, kind: input, shape index: {}]   ;;  %s2946_s7 = inlined_call_operand.hbm [shape: f32[32,256], index: 7, kind: output, shape index: {}]  }
   0x1   :  { %14 = vsyncpa [#allocation3 + $0x1], 0 }
   0x2   :  { %15 = vsyncpa [#allocation6], 0 }
   0x3   :  { %16 = vsyncpa [#allocation9], 0 }
   0x4   :  { %17 = vsyncpa [#allocation12], 0 }
   0x5   :  { %18 = vsyncpa [#allocation4], 0 }
   0x6   :  { %20 = vsyncpa [#allocation4 + $0x1], 0  ;;  %s2550_s24 = smov 0   ;;  %s2552_s25 = smov 0  }
   0x7   :  { %s2554_s26 = smov 0   ;;  %s2556_s27 = smov 0  }
   0x8 LB: > { %s2495_s28 = smov [#allocation5]   ;;  %s2571_s30 = sadd.s32 4294967295, %s2493_s27   ;;  %s2493_s27 = sphi %s2556_s27, %s2971_s27   ;;  %s2489_s26 = sphi %s2554_s26, %s2970_s26   ;;  %s2485_s25 = sphi %s2552_s25, %s2969_s25   ;;  %s2481_s24 = sphi %s2550_s24, %s2968_s24  }
   0x9   : > { %s221_s29 = sshll.u32 %s2495_s28, 4  ;;  %p1702_p0 = scmp.ge.s32.totalorder %s2493_s27, 1  ;;  %s2576_s29 = int_to_ptr.vmem [resolvable:$true] %s221_s29 }
   0xa   : > { %p2947_p1 = scmp.eq.s32.totalorder %s2571_s30, 0  ;;  %p209_p2 = scmp.lt.s32.totalorder %s2493_s27, 3 }
   0xb   : > { %s2496_s9 = smov [#allocation8]   ;;  %s2497_s12 = smov [#allocation7]  }
   0xc   : > { %p2578_p3 = pnand %p1702_p0, %p209_p2  ;;  %s250_s10 = sshll.u32 %s2496_s9, 4  ;;  %s2591_s10 = int_to_ptr.vmem [resolvable:$true] %s250_s10 }
   0xd   : > { %s237_s13 = sshll.u32 %s2497_s12, 4  ;;  %s2245_s16 = scalar_lea.hbm %s2940_s1, 8192  ;;  %s2593_s13 = int_to_ptr.vmem [resolvable:$true] %s237_s13 }
   0xe   : > { %s2950_s8 = scalar_select %p2578_p3, 1, 0 }
   0xf   : > { %p2068_p5 = pneg %p2578_p3  ;;  %p2246_p7 = scmp.ne.s32.totalorder %s2940_s1, %s2245_s16 }
  0x10   : > { %p2252_p11 = scmp.lt.u32.totalorder %s2245_s16, %s2940_s1 }
  0x11   : > { %p2587_p6 = pnand %p2068_p5, %p2947_p1 }
  0x13   : > { %p2603_p8 = pneg %p2587_p6 }
  0x15   : > { %p2248_p9 = pnand %p2603_p8, %p2246_p7 }
  0x17   : > { %p2249_p10 = pneg %p2248_p9 }
  0x19   : > { %p2254_p12 = pnand %p2252_p11, %p2249_p10 }
  0x1b   : > { %2257 = shalt.err (!%p2254_p12)
}
  0x1c   : > { %s2258_s22 = scalar_lea.vmem %s2576_s29, 8192  ;;  %p2266_p5 = scmp.lt.s32.totalorder %s2576_s29, %s2576_s29 }
  0x1d   : > { %p2259_p13 = scmp.ne.s32.totalorder %s2576_s29, %s2258_s22  ;;  %p2267_p4 = scmp.lt.s32.totalorder %s2258_s22, %s2258_s22 }
  0x1f   : > { %p2261_p0 = pnand %p2259_p13, %p2603_p8  ;;  %p2268_p7 = por %p2267_p4, %p2266_p5 }
  0x21   : > { %p2262_p2 = pneg %p2261_p0 }
  0x23   : > { %p2269_p9 = pnand %p2268_p7, %p2262_p2 }
  0x25   : > { %2272 = shalt.err (!%p2269_p9)
}
  0x26   : > { %s2498_s23 = smov 64   ;;  %s2499_s28 = smov 4  }
  0x27   : > { %2071 = dma.hbm_to_vmem [thread:$0]  (!%p2587_p6), %s2940_s1, 8192, %s2576_s29, [#allocation6], %s2498_s23, %s2498_s23, %s2499_s28  }
  0x28   : > { %s2273_s16 = scalar_lea.hbm %s2943_s4, 1024 }
  0x29   : > { %p2274_p4 = scmp.ne.s32.totalorder %s2943_s4, %s2273_s16  ;;  %p2280_p12 = scmp.lt.u32.totalorder %s2273_s16, %s2943_s4 }
  0x2b   : > { %p2276_p10 = pnand %p2274_p4, %p2603_p8 }
  0x2d   : > { %p2277_p11 = pneg %p2276_p10 }
  0x2f   : > { %p2282_p13 = pnand %p2280_p12, %p2277_p11 }
  0x31   : > { %2285 = shalt.err (!%p2282_p13)
}
  0x32   : > { %s2286_s29 = scalar_lea.vmem %s2591_s10, 1024  ;;  %p2294_p7 = scmp.lt.s32.totalorder %s2591_s10, %s2591_s10 }
  0x33   : > { %p2287_p0 = scmp.ne.s32.totalorder %s2591_s10, %s2286_s29  ;;  %p2295_p9 = scmp.lt.s32.totalorder %s2286_s29, %s2286_s29 }
  0x35   : > { %p2289_p2 = pnand %p2287_p0, %p2603_p8  ;;  %p2296_p4 = por %p2295_p9, %p2294_p7 }
  0x37   : > { %p2290_p5 = pneg %p2289_p2 }
  0x39   : > { %p2297_p10 = pnand %p2296_p4, %p2290_p5 }
  0x3b   : > { %2300 = shalt.err (!%p2297_p10)
}
  0x3c   : > { %2077 = dma.hbm_to_vmem [thread:$0]  (!%p2587_p6), %s2943_s4, 1024, %s2591_s10, [#allocation9], %s2498_s23, %s2498_s23, %s2499_s28  }
  0x3d   : > { %s2301_s15 = scalar_lea.hbm %s2942_s3, 1024 }
  0x3e   : > { %p2302_p11 = scmp.ne.s32.totalorder %s2942_s3, %s2301_s15  ;;  %p2308_p0 = scmp.lt.u32.totalorder %s2301_s15, %s2942_s3 }
  0x40   : > { %p2304_p12 = pnand %p2302_p11, %p2603_p8 }
  0x42   : > { %p2305_p13 = pneg %p2304_p12 }
  0x44   : > { %p2310_p2 = pnand %p2308_p0, %p2305_p13 }
  0x46   : > { %2313 = shalt.err (!%p2310_p2)
}
  0x47   : > { %s2314_s10 = scalar_lea.vmem %s2593_s13, 1024  ;;  %p2322_p4 = scmp.lt.s32.totalorder %s2593_s13, %s2593_s13 }
  0x48   : > { %p2315_p5 = scmp.ne.s32.totalorder %s2593_s13, %s2314_s10  ;;  %p2323_p10 = scmp.lt.s32.totalorder %s2314_s10, %s2314_s10 }
  0x4a   : > { %p2317_p7 = pnand %p2315_p5, %p2603_p8  ;;  %p2324_p11 = por %p2323_p10, %p2322_p4 }
  0x4c   : > { %p2318_p9 = pneg %p2317_p7 }
  0x4e   : > { %p2325_p12 = pnand %p2324_p11, %p2318_p9 }
  0x50   : > { %2328 = shalt.err (!%p2325_p12)
}
  0x51   : > { %2074 = dma.hbm_to_vmem [thread:$0]  (!%p2587_p6), %s2942_s3, 1024, %s2593_s13, [#allocation6], %s2498_s23, %s2498_s23, %s2499_s28  }
  0x52   : > { %s2500_s22 = smov [#allocation10]   ;;  %s2501_s12 = smov [#allocation11]  }
  0x53   : > { %s263_s9 = sshll.u32 %s2500_s22, 4  ;;  %s276_s14 = sshll.u32 %s2501_s12, 4  ;;  %s264_s9 = int_to_ptr.vmem [resolvable:$true] %s263_s9  ;;  %s277_s14 = int_to_ptr.vmem [resolvable:$true] %s276_s14 }
  0x54   : > { %s2329_s17 = scalar_lea.hbm %s2944_s5, 1024 }
  0x55   : > { %p2330_p13 = scmp.ne.s32.totalorder %s2944_s5, %s2329_s17  ;;  %p2336_p5 = scmp.lt.u32.totalorder %s2329_s17, %s2944_s5 }
  0x57   : > { %p2332_p0 = pnand %p2330_p13, %p2603_p8 }
  0x59   : > { %p2333_p2 = pneg %p2332_p0 }
  0x5b   : > { %p2338_p7 = pnand %p2336_p5, %p2333_p2 }
  0x5d   : > { %2341 = shalt.err (!%p2338_p7)
}
  0x5e   : > { %s2342_s13 = scalar_lea.vmem %s264_s9, 1024  ;;  %p2350_p11 = scmp.lt.s32.totalorder %s264_s9, %s264_s9 }
  0x5f   : > { %p2343_p9 = scmp.ne.s32.totalorder %s264_s9, %s2342_s13  ;;  %p2351_p12 = scmp.lt.s32.totalorder %s2342_s13, %s2342_s13 }
  0x61   : > { %p2345_p4 = pnand %p2343_p9, %p2603_p8  ;;  %p2352_p1 = por %p2351_p12, %p2350_p11 }
  0x63   : > { %p2346_p10 = pneg %p2345_p4 }
  0x65   : > { %p2353_p3 = pnand %p2352_p1, %p2346_p10 }
  0x67   : > { %2356 = shalt.err (!%p2353_p3)
}
  0x68   : > { %2080 = dma.hbm_to_vmem [thread:$0]  (!%p2587_p6), %s2944_s5, 1024, %s264_s9, [#allocation9], %s2498_s23, %s2498_s23, %s2499_s28  }
  0x69   : > { %s2357_s16 = scalar_lea.hbm %s2945_s6, 1024 }
  0x6a   : > { %p2358_p1 = scmp.ne.s32.totalorder %s2945_s6, %s2357_s16  ;;  %p2364_p0 = scmp.lt.u32.totalorder %s2357_s16, %s2945_s6 }
  0x6c   : > { %p2360_p3 = pnand %p2358_p1, %p2603_p8 }
  0x6e   : > { %p2361_p13 = pneg %p2360_p3 }
  0x70   : > { %p2366_p2 = pnand %p2364_p0, %p2361_p13 }
  0x72   : > { %2369 = shalt.err (!%p2366_p2)
}
  0x73   : > { %s2370_s21 = scalar_lea.vmem %s277_s14, 1024  ;;  %p2378_p4 = scmp.lt.s32.totalorder %s277_s14, %s277_s14 }
  0x74   : > { %p2371_p5 = scmp.ne.s32.totalorder %s277_s14, %s2370_s21  ;;  %p2379_p10 = scmp.lt.s32.totalorder %s2370_s21, %s2370_s21 }
  0x76   : > { %p2373_p7 = pnand %p2371_p5, %p2603_p8  ;;  %p2380_p11 = por %p2379_p10, %p2378_p4 }
  0x78   : > { %p2374_p9 = pneg %p2373_p7 }
  0x7a   : > { %p2381_p12 = pnand %p2380_p11, %p2374_p9 }
  0x7c   : > { %2384 = shalt.err (!%p2381_p12)
}
  0x7d   : > { %2083 = dma.hbm_to_vmem [thread:$0]  (!%p2587_p6), %s2945_s6, 1024, %s277_s14, [#allocation12], %s2498_s23, %s2498_s23, %s2499_s28  }
  0x7e   : > { %s1701_s11 = sadd.s32 4294967294, %s2493_s27   ;;  %s2723_s19 = sadd.s32 1, %s2493_s27  }
  0x7f   : > { %s33_s29 = sadd.s32 1, %s2489_s26  ;;  %s30_s22 = ssub.s32 %s2493_s27, %s2723_s19 }
  0x80   : > { %p40_p8 = scmp.ne.s32.totalorder %s2489_s26, %s2485_s25  ;;  %p31_p1 = scmp.eq.s32.totalorder %s30_s22, 0 }
  0x81   : > { %p41_p3 = scmp.eq.s32.totalorder %s2493_s27, 0  ;;  %p46_p13 = scmp.ne.s32.totalorder %s2485_s25, %s2481_s24 }
  0x82   : > { %p196_p0 = scmp.eq.s32.totalorder %s2571_s30, 1  ;;  %p2953_p5 = scmp.eq.s32.totalorder %s2571_s30, 0 }
  0x83   : > { %s2735_s12 = scalar_select %p31_p1, %s2489_s26, %s33_s29  }
  0x84   : > { %p42_p2 = por %p41_p3, %p40_p8  ;;  %p2739_p7 = por %p2953_p5, %p46_p13 }
  0x85   : > { %p2743_p6 = por %p196_p0, %p40_p8  ;;  %p202_p9 = scmp.eq.s32.totalorder %s1701_s11, 1 }
  0x86   : > { %p2097_p4 = scmp.lt.s32.totalorder %s2493_s27, 2  ;;  %s290_s28 = sand.u32 1, %s2489_s26  }
  0x87   : > { %s2955_s23 = scalar_select %p2743_p6, 1, 0 }
  0x88   : > { %p2749_p10 = por %p202_p9, %p46_p13  ;;  %s1709_s16 = sshll.u32 %s290_s28, 6 }
  0x89   : > { %s1837_s17 = sshll.u32 %s2493_s27, 10  ;;  %s294_s21 = scalar_lea.vmem [#allocation2], %s1709_s16 }
  0x8a   : > { %s2956_s14 = scalar_select %p2749_p10, 1, 0 }
  0x8b   : > { %s2757_s10 = scalar_lea.hbm %s2939_s0, %s1837_s17  ;;  %s302_s9 = sshll.u32 %s294_s21, 4  ;;  %s2763_s9 = int_to_ptr.vmem [resolvable:$true] %s302_s9 }
  0x8c   : > { %p2759_p11 = pnand %p2097_p4, %p42_p2  ;;  %s2765_s11 = scalar_lea.sflag [#allocation3], %s290_s28 }
  0x8d   : > { %s2385_s29 = scalar_lea.hbm %s2757_s10, 1024  ;;  %s2390_s17 = scalar_lea.hbm %s2939_s0, 2048 }
  0x8e   : > { %p2386_p12 = scmp.ne.s32.totalorder %s2757_s10, %s2385_s29  ;;  %p2387_p8 = pneg %p2759_p11 }
  0x8f   : > { %p2391_p13 = scmp.lt.u32.totalorder %s2757_s10, %s2939_s0  ;;  %p2392_p0 = scmp.lt.u32.totalorder %s2390_s17, %s2385_s29 }
  0x90   : > { %p2388_p1 = pnand %p2387_p8, %p2386_p12  ;;  %p2394_p5 = scmp.lt.u32.totalorder %s2385_s29, %s2757_s10 }
  0x91   : > { %p2393_p2 = por %p2392_p0, %p2391_p13 }
  0x92   : > { %p2389_p3 = pneg %p2388_p1 }
  0x93   : > { %p2395_p9 = por %p2394_p5, %p2393_p2 }
  0x95   : > { %p2396_p4 = pnand %p2395_p9, %p2389_p3 }
  0x97   : > { %2399 = shalt.err (!%p2396_p4)
}
  0x98   : > { %s2400_s28 = scalar_lea.vmem %s2763_s9, 1024  ;;  %s2502_s21 = smov [#allocation2]  }
  0x99   : > { %p2401_p12 = scmp.ne.s32.totalorder %s2763_s9, %s2400_s28  ;;  %s2405_s22 = sshll.u32 %s2502_s21, 4  ;;  %s2406_s22 = int_to_ptr.vmem [resolvable:$false] %s2405_s22 }
  0x9a   : > { %s2407_s16 = scalar_lea.vmem %s2406_s22, 2048  ;;  %p2408_p6 = scmp.lt.s32.totalorder %s2763_s9, %s2406_s22 }
  0x9b   : > { %p2403_p1 = pnand %p2401_p12, %p2387_p8  ;;  %p2409_p13 = scmp.lt.s32.totalorder %s2407_s16, %s2400_s28 }
  0x9d   : > { %p2404_p10 = pneg %p2403_p1  ;;  %p2410_p0 = por %p2409_p13, %p2408_p6 }
  0x9f   : > { %p2411_p2 = pnand %p2410_p0, %p2404_p10 }
  0xa1   : > { %2414 = shalt.err (!%p2411_p2)
}
  0xa2   : > { %s2503_s29 = smov 512   ;;  %s2504_s17 = smov 32  }
  0xa3   : > { %2087 = dma.hbm_to_vmem [thread:$0]  (!%p2759_p11), %s2757_s10, 1024, %s2763_s9, %s2765_s11, %s2503_s29, %s2503_s29, %s2504_s17  }
  0xa4   : > { %p2958_p8 = scmp.ne.s32.totalorder %s2950_s8, 0 }
  0xa5   : > { %s2796_s18 = sand.u32 (!%p2958_p8), 1, %s2485_s25  }
  0xa6   : > { %314 = sbr.rel (%p2958_p8) target bundleno = 1362 (0x552), region = 48  ;;  %s1714_s20 = sshll.u32 (!%p2958_p8), %s2796_s18, 6 }
  0xa7   : > { %s317_s28 = scalar_lea.sflag (!%p2958_p8), [#allocation3], %s2796_s18  ;;  %s2800_s21 = scalar_lea.vmem (!%p2958_p8), [#allocation2], %s1714_s20 }
  0xad   : > { %2460 = dma.done.wait (%p2739_p7), %s317_s28, 1024  }
  0xae   : > { %2462 = vsyncadd (%p2739_p7), %s317_s28, 4294966272  ;;  %p2959_p6 = scmp.eq.s32.totalorder %s2571_s30, 0 }
  0xb0   : > { %2464 = dma.done.wait (%p2959_p6), [#allocation6], 9216   ;;  %p2960_p10 = pmov %p2959_p6 }
  0xb1   : > { %p2961_p11 = pmov %p2959_p6 }
  0xb2   : > { %2466 = vsyncadd (%p2960_p10), [#allocation6], 4294958080 }
  0xb3   : > { %2468 = dma.done.wait (%p2961_p11), [#allocation9], 2048   ;;  %p2962_p3 = pmov %p2959_p6 }
  0xb5   : > { %2470 = vsyncadd (%p2962_p3), [#allocation9], 4294965248  ;;  %p2963_p5 = pmov %p2962_p3 }
  0xb6   : > { %p2964_p9 = pmov %p2962_p3 }
  0xb7   : > { %2472 = dma.done.wait (%p2963_p5), [#allocation12], 1024  }
  0xb8   : > { %2474 = vsyncadd (%p2964_p9), [#allocation12], 4294966272  ;;  %v2149_v0 = vld [vmem:[#allocation5 + $0x40] sm:$0xff]   ;;  %v2153_v4 = vld [vmem:[#allocation5 + $0x48] sm:$0xff]   ;;  %vm2506_vm0 = vmmov 0   ;;  %s1720_s13 = sshll.u32 %s2796_s18, 5 }
  0xb9   : > { %v2150_v1 = vld [vmem:[#allocation5 + $0xc0] sm:$0xff]   ;;  %1840 = vmatprep.subr.bf16.mxu0 %v2149_v0  ;;  %v2154_v5 = vld [vmem:[#allocation5 + $0xc8] sm:$0xff]   ;;  %v2157_v8 = vld [vmem:[#allocation5 + $0x50] sm:$0xff]   ;;  %s2875_s16 = scalar_lea.vmem [#allocation13], %s1720_s13  ;;  %s1839_s8 = sshll.u32 %s2571_s30, 9 }
  0xba   : > { %v2151_v2 = vld [vmem:[#allocation5] sm:$0xff]   ;;  %1862 = vmatprep.subr.bf16.mxu1 %v2150_v1  ;;  %v2155_v6 = vld [vmem:[#allocation5 + $0x8] sm:$0xff]   ;;  %v2158_v9 = vld [vmem:[#allocation5 + $0xd0] sm:$0xff]   ;;  %s1580_s20 = sshll.u32 %s2875_s16, 4  ;;  %s2893_s9 = scalar_lea.hbm %s2946_s7, %s1839_s8  ;;  %s2888_s20 = int_to_ptr.vmem [resolvable:$true] %s1580_s20 }
  0xbb   : > { %v2152_v3 = vld [vmem:[#allocation5 + $0x80] sm:$0xff]   ;;  %1841 = vmatpush3.bf16.msra.mxu0 %v2151_v2  ;;  %v2156_v7 = vld [vmem:[#allocation5 + $0x88] sm:$0xff]   ;;  %v2159_v10 = vld [vmem:[#allocation5 + $0x10] sm:$0xff]   ;;  %s1566_s13 = scalar_lea.sflag [#allocation4], %s2796_s18  ;;  %s2415_s30 = scalar_lea.vmem %s2888_s20, 512 }
  0xbc   : > { %1863 = vmatpush3.bf16.msra.mxu1 %v2152_v3  ;;  %1842 = vmatprep.subr.bf16.mxu0 %v2153_v4  ;;  %v2160_v11 = vld [vmem:[#allocation5 + $0x90] sm:$0xff]   ;;  %v2161_v12 = vld [vmem:[#allocation5 + $0x58] sm:$0xff]   ;;  %v2165_v16 = vld [vmem:[#allocation5 + $0x60] sm:$0xff]   ;;  %p2416_p7 = scmp.ne.s32.totalorder %s2888_s20, %s2415_s30  ;;  %p2965_p4 = scmp.ne.s32.totalorder %s2955_s23, 0 }
  0xbd   : > { %1864 = vmatprep.subr.bf16.mxu1 %v2154_v5  ;;  %v2162_v13 = vld [vmem:[#allocation5 + $0xd8] sm:$0xff]   ;;  %v2166_v17 = vld [vmem:[#allocation5 + $0xe0] sm:$0xff]   ;;  %v2169_v20 = vld [vmem:[#allocation5 + $0x68] sm:$0xff]   ;;  %s2507_s11 = smov [#allocation13]  }
  0xbe   : > { %v2163_v14 = vld [vmem:[#allocation5 + $0x18] sm:$0xff]   ;;  %v2167_v18 = vld [vmem:[#allocation5 + $0x20] sm:$0xff]   ;;  %v2170_v21 = vld [vmem:[#allocation5 + $0xe8] sm:$0xff]   ;;  %p2417_p12 = pnand %p2416_p7, %p2965_p4  ;;  %s2419_s22 = sshll.u32 %s2507_s11, 4  ;;  %s2420_s22 = int_to_ptr.vmem [resolvable:$false] %s2419_s22 }
  0xbf   : > { %1843 = vmatpush3.bf16.msra.mxu0 %v2155_v6  ;;  %v2164_v15 = vld [vmem:[#allocation5 + $0x98] sm:$0xff]   ;;  %v2168_v19 = vld [vmem:[#allocation5 + $0xa0] sm:$0xff]   ;;  %v2171_v22 = vld [vmem:[#allocation5 + $0x28] sm:$0xff]   ;;  %s2421_s29 = scalar_lea.vmem %s2420_s22, 1024  ;;  %p2422_p13 = scmp.lt.s32.totalorder %s2888_s20, %s2420_s22 }
  0xc0   : > { %1865 = vmatpush3.bf16.msra.mxu1 %v2156_v7  ;;  %1844 = vmatprep.subr.bf16.mxu0 %v2157_v8  ;;  %v2172_v23 = vld [vmem:[#allocation5 + $0xa8] sm:$0xff]   ;;  %v2173_v24 = vld [vmem:[#allocation5 + $0x70] sm:$0xff]   ;;  %v2177_v28 = vld [vmem:[#allocation5 + $0x78] sm:$0xff]   ;;  %p2418_p1 = pneg %p2417_p12  ;;  %p2423_p0 = scmp.lt.s32.totalorder %s2421_s29, %s2415_s30 }
  0xc1   : > { %1866 = vmatprep.subr.bf16.mxu1 %v2158_v9  ;;  %v2174_v25 = vld [vmem:[#allocation5 + $0xf0] sm:$0xff]   ;;  %v2178_v29 = vld [vmem:[#allocation5 + $0xf8] sm:$0xff]   ;;  %v374_v32 = vld [vmem:[%s2800_s21] sm:$0xff] }
  0xc2   : > { %v2175_v26 = vld [vmem:[#allocation5 + $0x30] sm:$0xff]   ;;  %v2179_v30 = vld [vmem:[#allocation5 + $0x38] sm:$0xff]   ;;  %v378_v33 = vld [vmem:[%s2800_s21 + $0x20] sm:$0xff]  ;;  %p2424_p2 = por %p2423_p0, %p2422_p13 }
  0xc3   : > { %1845 = vmatpush3.bf16.msra.mxu0 %v2159_v10  ;;  %v2176_v27 = vld [vmem:[#allocation5 + $0xb0] sm:$0xff]   ;;  %v2180_v31 = vld [vmem:[#allocation5 + $0xb8] sm:$0xff]   ;;  %v375_v34 = vld [vmem:[%s2800_s21 + $0x8] sm:$0xff]  ;;  %v1722_v35 = vcombine.low %v374_v32, %v378_v33  ;;  %v1723_v36 = vcombine.high %v374_v32, %v378_v33 }
  0xc4   : > { %1867 = vmatpush3.bf16.msra.mxu1 %v2160_v11  ;;  %1846 = vmatprep.subr.bf16.mxu0 %v2161_v12  ;;  %v379_v37 = vld [vmem:[%s2800_s21 + $0x28] sm:$0xff]  ;;  %v2181_v40 = vld [vmem:[#allocation5 + $0x140] sm:$0xff]   ;;  %v2189_v48 = vld [vmem:[#allocation5 + $0x150] sm:$0xff]   ;;  %p2425_p8 = pnand %p2424_p2, %p2418_p1 }
  0xc5   : > { %1868 = vmatprep.subr.bf16.mxu1 %v2162_v13  ;;  %v1724_v38 = vcombine.low %v375_v34, %v379_v37  ;;  %v1725_v39 = vcombine.high %v375_v34, %v379_v37  ;;  %973 = vmatprep.mubr.bf16.mxu0 %v1723_v36  ;;  %v2182_v41 = vld [vmem:[#allocation5 + $0x1c0] sm:$0xff]   ;;  %v2185_v44 = vld [vmem:[#allocation5 + $0x148] sm:$0xff]   ;;  %v2190_v49 = vld [vmem:[#allocation5 + $0x1d0] sm:$0xff]  }
  0xc6   : > { %v2183_v42 = vld [vmem:[#allocation5 + $0x100] sm:$0xff]   ;;  %v2186_v45 = vld [vmem:[#allocation5 + $0x1c8] sm:$0xff]   ;;  %v2191_v50 = vld [vmem:[#allocation5 + $0x110] sm:$0xff]  }
  0xc7   : > { %1847 = vmatpush3.bf16.msra.mxu0 %v2163_v14  ;;  %1014 = vmatprep.mubr.bf16.mxu1 %v1725_v39  ;;  %v2184_v43 = vld [vmem:[#allocation5 + $0x180] sm:$0xff]   ;;  %v2187_v46 = vld [vmem:[#allocation5 + $0x108] sm:$0xff]   ;;  %v2192_v51 = vld [vmem:[#allocation5 + $0x190] sm:$0xff]  }
  0xc8   : > { %1869 = vmatpush3.bf16.msra.mxu1 %v2164_v15  ;;  %1848 = vmatprep.subr.bf16.mxu0 %v2165_v16  ;;  %v2188_v47 = vld [vmem:[#allocation5 + $0x188] sm:$0xff]   ;;  %v2193_v52 = vld [vmem:[#allocation5 + $0x158] sm:$0xff]   ;;  %v2197_v56 = vld [vmem:[#allocation5 + $0x160] sm:$0xff]  }
  0xc9   : > { %1870 = vmatprep.subr.bf16.mxu1 %v2166_v17  ;;  %v2194_v53 = vld [vmem:[#allocation5 + $0x1d8] sm:$0xff]   ;;  %v2198_v57 = vld [vmem:[#allocation5 + $0x1e0] sm:$0xff]   ;;  %v2201_v60 = vld [vmem:[#allocation5 + $0x168] sm:$0xff]   ;;  %v2505_v17 = vmov 0.0  }
  0xca   : > { %v2195_v54 = vld [vmem:[#allocation5 + $0x118] sm:$0xff]   ;;  %v2199_v58 = vld [vmem:[#allocation5 + $0x120] sm:$0xff]   ;;  %v2202_v61 = vld [vmem:[#allocation5 + $0x1e8] sm:$0xff]  }
  0xcb   : > { %1849 = vmatpush3.bf16.msra.mxu0 %v2167_v18  ;;  %v2196_v55 = vld [vmem:[#allocation5 + $0x198] sm:$0xff]   ;;  %v2200_v59 = vld [vmem:[#allocation5 + $0x1a0] sm:$0xff]   ;;  %v2203_v62 = vld [vmem:[#allocation5 + $0x128] sm:$0xff]  }
  0xcc   : > { %1871 = vmatpush3.bf16.msra.mxu1 %v2168_v19  ;;  %1850 = vmatprep.subr.bf16.mxu0 %v2169_v20  ;;  %v2204_v63 = vld [vmem:[#allocation5 + $0x1a8] sm:$0xff]   ;;  %v2205_v0 = vld [vmem:[#allocation5 + $0x170] sm:$0xff]   ;;  %v2209_v4 = vld [vmem:[#allocation5 + $0x178] sm:$0xff]  }
  0xcd   : > { %1872 = vmatprep.subr.bf16.mxu1 %v2170_v21  ;;  %v2206_v1 = vld [vmem:[#allocation5 + $0x1f0] sm:$0xff]   ;;  %v2210_v5 = vld [vmem:[#allocation5 + $0x1f8] sm:$0xff]   ;;  %v2213_v16 = vld [vmem:[#allocation7] sm:$0xff]  }
  0xce   : > { %v2207_v2 = vld [vmem:[#allocation5 + $0x130] sm:$0xff]   ;;  %v2211_v6 = vld [vmem:[#allocation5 + $0x138] sm:$0xff]   ;;  %v2214_v18 = vld [vmem:[#allocation7 + $0x8] sm:$0xff]  }
  0xcf   : > { %1851 = vmatpush3.bf16.msra.mxu0 %v2171_v22  ;;  %v2208_v3 = vld [vmem:[#allocation5 + $0x1b0] sm:$0xff]   ;;  %v2212_v7 = vld [vmem:[#allocation5 + $0x1b8] sm:$0xff]   ;;  %v2217_v21 = vld [vmem:[#allocation7 + $0x20] sm:$0xff]  }
  0xd0   : > { %1873 = vmatpush3.bf16.msra.mxu1 %v2172_v23  ;;  %1852 = vmatprep.subr.bf16.mxu0 %v2173_v24  ;;  %v376_v8 = vld [vmem:[%s2800_s21 + $0x10] sm:$0xff]  ;;  %v377_v12 = vld [vmem:[%s2800_s21 + $0x18] sm:$0xff]  ;;  %v2218_v22 = vld [vmem:[#allocation7 + $0x28] sm:$0xff]  }
  0xd1   : > { %1874 = vmatprep.subr.bf16.mxu1 %v2174_v25  ;;  %v380_v9 = vld [vmem:[%s2800_s21 + $0x30] sm:$0xff]  ;;  %v381_v13 = vld [vmem:[%s2800_s21 + $0x38] sm:$0xff]  ;;  %v2221_v25 = vld [vmem:[#allocation8] sm:$0xff]  }
  0xd2   : > { %v1726_v10 = vcombine.low %v376_v8, %v380_v9  ;;  %v1727_v11 = vcombine.high %v376_v8, %v380_v9  ;;  %v1728_v14 = vcombine.low %v377_v12, %v381_v13  ;;  %v1729_v15 = vcombine.high %v377_v12, %v381_v13  ;;  %v2215_v19 = vld [vmem:[#allocation7 + $0x10] sm:$0xff]   ;;  %v2216_v20 = vld [vmem:[#allocation7 + $0x18] sm:$0xff]   ;;  %v1721_v33 = vld [vmem:[%s2941_s2] ss:$0 sm:$0xff] }
  0xd3   : > { %1853 = vmatpush3.bf16.msra.mxu0 %v2175_v26  ;;  %v2219_v23 = vld [vmem:[#allocation7 + $0x30] sm:$0xff]   ;;  %v2220_v24 = vld [vmem:[#allocation7 + $0x38] sm:$0xff]   ;;  %v2222_v26 = vld [vmem:[#allocation8 + $0x8] sm:$0xff]  }
  0xd4   : > { %1875 = vmatpush3.bf16.msra.mxu1 %v2176_v27  ;;  %1854 = vmatprep.subr.bf16.mxu0 %v2177_v28  ;;  %v2223_v27 = vld [vmem:[#allocation8 + $0x10] sm:$0xff]   ;;  %v2224_v28 = vld [vmem:[#allocation8 + $0x18] sm:$0xff]   ;;  %v2234_v8 = vld [vmem:[#allocation10 + $0x28] sm:$0xff]  }
  0xd5   : > { %1876 = vmatprep.subr.bf16.mxu1 %v2178_v29  ;;  %v2225_v29 = vld [vmem:[#allocation8 + $0x20] sm:$0xff]  }
  0xd6   : > { %v1794_v9 = vld [vmem:[%s2941_s2 + $0x1] ss:$0 sm:$0xff] }
  0xd7   : > { %1855 = vmatpush3.bf16.msra.mxu0 %v2179_v30  ;;  %v2226_v30 = vld [vmem:[#allocation8 + $0x28] sm:$0xff]  }
  0xd8   : > { %1877 = vmatpush3.bf16.msra.mxu1 %v2180_v31  ;;  %1884 = vmatprep.subr.bf16.mxu0 %v2181_v40 }
  0xd9   : > { %1906 = vmatprep.subr.bf16.mxu1 %v2182_v41 }
  0xda   : > { %974 = vmatmul.mubr.bf16.vlgmr.msra.gmra.mrb[0].mxu0 %v1722_v35 }
  0xdb   : > { %1015 = vmatmul.mubr.bf16.vlgmr.msra.gmra.mrb[0].mxu1 %v1724_v38  ;;  %1885 = vmatpush3.bf16.msra.mxu0 %v2183_v42 }
  0xdc   : > { %1907 = vmatpush3.bf16.msra.mxu1 %v2184_v43  ;;  %1886 = vmatprep.subr.bf16.mxu0 %v2185_v44 }
  0xdd   : > { %1908 = vmatprep.subr.bf16.mxu1 %v2186_v45  ;;  %1055 = vmatprep.mubr.bf16.mxu0 %v1727_v11 }
  0xde   : > { %1096 = vmatprep.mubr.bf16.mxu1 %v1729_v15 }
  0xdf   : > { %1887 = vmatpush3.bf16.msra.mxu0 %v2187_v46 }
  0xe0   : > { %1909 = vmatpush3.bf16.msra.mxu1 %v2188_v47  ;;  %1888 = vmatprep.subr.bf16.mxu0 %v2189_v48 }
  0xe1   : > { %1910 = vmatprep.subr.bf16.mxu1 %v2190_v49 }
  0xe3   : > { %1889 = vmatpush3.bf16.msra.mxu0 %v2191_v50 }
  0xe4   : > { %1911 = vmatpush3.bf16.msra.mxu1 %v2192_v51  ;;  %1890 = vmatprep.subr.bf16.mxu0 %v2193_v52 }
  0xe5   : > { %1912 = vmatprep.subr.bf16.mxu1 %v2194_v53 }
  0xe7   : > { %1891 = vmatpush3.bf16.msra.mxu0 %v2195_v54 }
  0xe8   : > { %1913 = vmatpush3.bf16.msra.mxu1 %v2196_v55  ;;  %1892 = vmatprep.subr.bf16.mxu0 %v2197_v56 }
  0xe9   : > { %1914 = vmatprep.subr.bf16.mxu1 %v2198_v57 }
  0xeb   : > { %1893 = vmatpush3.bf16.msra.mxu0 %v2199_v58 }
  0xec   : > { %1915 = vmatpush3.bf16.msra.mxu1 %v2200_v59  ;;  %1894 = vmatprep.subr.bf16.mxu0 %v2201_v60 }
  0xed   : > { %1916 = vmatprep.subr.bf16.mxu1 %v2202_v61 }
  0xef   : > { %1895 = vmatpush3.bf16.msra.mxu0 %v2203_v62 }
  0xf0   : > { %1917 = vmatpush3.bf16.msra.mxu1 %v2204_v63  ;;  %1896 = vmatprep.subr.bf16.mxu0 %v2205_v0 }
  0xf1   : > { %1918 = vmatprep.subr.bf16.mxu1 %v2206_v1  ;;  %v2227_v1 = vld [vmem:[#allocation8 + $0x30] sm:$0xff]  }
  0xf3   : > { %1897 = vmatpush3.bf16.msra.mxu0 %v2207_v2  ;;  %v2228_v2 = vld [vmem:[#allocation8 + $0x38] sm:$0xff]  }
  0xf4   : > { %1919 = vmatpush3.bf16.msra.mxu1 %v2208_v3  ;;  %1898 = vmatprep.subr.bf16.mxu0 %v2209_v4  ;;  %v2229_v3 = vld [vmem:[#allocation10] sm:$0xff]   ;;  %v2230_v4 = vld [vmem:[#allocation10 + $0x8] sm:$0xff]  }
  0xf5   : > { %1920 = vmatprep.subr.bf16.mxu1 %v2210_v5  ;;  %v2231_v5 = vld [vmem:[#allocation10 + $0x10] sm:$0xff]  }
  0xf7   : > { %1899 = vmatpush3.bf16.msra.mxu0 %v2211_v6  ;;  %v2232_v6 = vld [vmem:[#allocation10 + $0x18] sm:$0xff]  }
  0xf8   : > { %1921 = vmatpush3.bf16.msra.mxu1 %v2212_v7  ;;  %1964 = vmatprep.subr.bf16.mxu0 %v2505_v17  ;;  %v2233_v7 = vld [vmem:[#allocation10 + $0x20] sm:$0xff]  }
  0xf9   : > { %1984 = vmatprep.subr.bf16.mxu1 %v2505_v17 }
  0xfa   : > { %1056 = vmatmul.mubr.bf16.vlgmr.msra.gmra.mrb[4].mxu0 %v1726_v10 }
  0xfb   : > { %1097 = vmatmul.mubr.bf16.vlgmr.msra.gmra.mrb[4].mxu1 %v1728_v14  ;;  %1965 = vmatpush3.bf16.msra.mxu0 %v2213_v16 }
  0xfc   : > { %1966 = vmatprep.subr.bf16.mxu0 %v2505_v17  ;;  %1980 = vmatprep.mubr.msk.bf16.mxu0 %vm2506_vm0, %v2505_v17 }
  0xfd   : > { %2000 = vmatprep.mubr.msk.bf16.mxu1 %vm2506_vm0, %v2505_v17  ;;  %1985 = vmatpush3.bf16.msra.mxu1 %v2221_v25  ;;  %v2240_v25 = vld [vmem:[#allocation11 + $0x18] sm:$0xff]  }
  0xfe   : > { %1986 = vmatprep.subr.bf16.mxu1 %v2505_v17 }
  0xff   : > { %1967 = vmatpush3.bf16.msra.mxu0 %v2214_v18 }
 0x100   : > { %1968 = vmatprep.subr.bf16.mxu0 %v2505_v17 }
 0x101   : > { %1987 = vmatpush3.bf16.msra.mxu1 %v2222_v26  ;;  %v2241_v26 = vld [vmem:[#allocation11 + $0x20] sm:$0xff]  }
 0x102   : > { %1988 = vmatprep.subr.bf16.mxu1 %v2505_v17 }
 0x103   : > { %1969 = vmatpush3.bf16.msra.mxu0 %v2215_v19 }
 0x104   : > { %1970 = vmatprep.subr.bf16.mxu0 %v2505_v17 }
 0x105   : > { %1989 = vmatpush3.bf16.msra.mxu1 %v2223_v27  ;;  %v2242_v27 = vld [vmem:[#allocation11 + $0x28] sm:$0xff]  }
 0x106   : > { %1990 = vmatprep.subr.bf16.mxu1 %v2505_v17 }
 0x107   : > { %1971 = vmatpush3.bf16.msra.mxu0 %v2216_v20  ;;  %v2235_v20 = vld [vmem:[#allocation10 + $0x30] sm:$0xff]  }
 0x108   : > { %1972 = vmatprep.subr.bf16.mxu0 %v2505_v17 }
 0x109   : > { %1991 = vmatpush3.bf16.msra.mxu1 %v2224_v28  ;;  %v1803_v28 = vld [vmem:[%s2941_s2 + $0x2] ss:$0 sm:$0xff] }
 0x10a   : > { %1992 = vmatprep.subr.bf16.mxu1 %v2505_v17 }
 0x10b   : > { %1973 = vmatpush3.bf16.msra.mxu0 %v2217_v21  ;;  %v2236_v21 = vld [vmem:[#allocation10 + $0x38] sm:$0xff]  }
 0x10c   : > { %1974 = vmatprep.subr.bf16.mxu0 %v2505_v17 }
 0x10d   : > { %1993 = vmatpush3.bf16.msra.mxu1 %v2225_v29 }
 0x10e   : > { %1994 = vmatprep.subr.bf16.mxu1 %v2505_v17 }
 0x10f   : > { %1975 = vmatpush3.bf16.msra.mxu0 %v2218_v22  ;;  %v2237_v22 = vld [vmem:[#allocation11] sm:$0xff]  }
 0x110   : > { %1976 = vmatprep.subr.bf16.mxu0 %v2505_v17 }
 0x111   : > { %1995 = vmatpush3.bf16.msra.mxu1 %v2226_v30 }
 0x112   : > { %1996 = vmatprep.subr.bf16.mxu1 %v2505_v17 }
 0x113   : > { %1977 = vmatpush3.bf16.msra.mxu0 %v2219_v23  ;;  %v2238_v23 = vld [vmem:[#allocation11 + $0x8] sm:$0xff]  }
 0x114   : > { %1978 = vmatprep.subr.bf16.mxu0 %v2505_v17 }
 0x115   : > { %1997 = vmatpush3.bf16.msra.mxu1 %v2227_v1 }
 0x116   : > { %1998 = vmatprep.subr.bf16.mxu1 %v2505_v17 }
 0x117   : > { %1979 = vmatpush3.bf16.msra.mxu0 %v2220_v24  ;;  %v2239_v24 = vld [vmem:[#allocation11 + $0x10] sm:$0xff]  }
 0x118   : > { %2004 = vmatprep.subr.bf16.mxu0 %v2505_v17 }
 0x119   : > { %1999 = vmatpush3.bf16.msra.mxu1 %v2228_v2 }
 0x11a   : > { %2024 = vmatprep.subr.bf16.mxu1 %v2505_v17 }
 0x1ad   : > { %v1856_v31 = vpop.f32.mrb[0].mxu0 }
 0x1ae   : > { %v1878_v32 = vpop.f32.mrb[0].mxu1  ;;  %v1857_v34 = vpop.f32.mrb[1].mxu0 }
 0x1af   : > { %v1858_v35 = vadd.f32 %v1857_v34, %v1856_v31  ;;  %v1879_v36 = vpop.f32.mrb[1].mxu1  ;;  %v1859_v37 = vpop.f32.mrb[2].mxu0 }
 0x1b0   : > { %v1880_v38 = vadd.f32 %v1879_v36, %v1878_v32  ;;  %v1881_v39 = vpop.f32.mrb[2].mxu1  ;;  %v1860_v40 = vpop.f32.mrb[3].mxu0  ;;  %v2243_v36 = vld [vmem:[#allocation11 + $0x30] sm:$0xff]  }
 0x1b1   : > { %v976_v41 = vadd.f32 %v1858_v35, %v1721_v33  ;;  %v1861_v42 = vadd.f32 %v1860_v40, %v1859_v37  ;;  %v1882_v43 = vpop.f32.mrb[3].mxu1  ;;  %v2244_v37 = vld [vmem:[#allocation11 + $0x38] sm:$0xff]  }
 0x1b2   : > { %v1883_v44 = vadd.f32 %v1882_v43, %v1881_v39 }
 0x1b3   : > { %v1017_v45 = vadd.f32 %v1880_v38, %v976_v41  ;;  %v979_v46 = vadd.f32 %v1861_v42, %v1721_v33  ;;  %v1812_v38 = vld [vmem:[%s2941_s2 + $0x3] ss:$0 sm:$0xff] }
 0x1b5   : > { %v1020_v47 = vadd.f32 %v1883_v44, %v979_v46 }
 0x1cd   : > { %v1900_v48 = vpop.f32.mrb[4].mxu0 }
 0x1ce   : > { %v1922_v49 = vpop.f32.mrb[4].mxu1  ;;  %v1901_v50 = vpop.f32.mrb[5].mxu0 }
 0x1cf   : > { %v1902_v51 = vadd.f32 %v1901_v50, %v1900_v48  ;;  %v1923_v52 = vpop.f32.mrb[5].mxu1  ;;  %v1903_v53 = vpop.f32.mrb[6].mxu0 }
 0x1d0   : > { %v1924_v54 = vadd.f32 %v1923_v52, %v1922_v49  ;;  %v1925_v55 = vpop.f32.mrb[6].mxu1  ;;  %v1904_v56 = vpop.f32.mrb[7].mxu0 }
 0x1d1   : > { %v1058_v57 = vadd.f32 %v1902_v51, %v1017_v45  ;;  %v1905_v58 = vadd.f32 %v1904_v56, %v1903_v53  ;;  %v1926_v59 = vpop.f32.mrb[7].mxu1 }
 0x1d2   : > { %v1927_v60 = vadd.f32 %v1926_v59, %v1925_v55 }
 0x1d3   : > { %v1099_v61 = vadd.f32 %v1924_v54, %v1058_v57  ;;  %v1061_v62 = vadd.f32 %v1905_v58, %v1020_v47 }
 0x1d5   : > { %v1102_v63 = vadd.f32 %v1927_v60, %v1061_v62 }
 0x1d7   : > { %v1137_v0 = vpack.c.bf16 %v1102_v63, %v1099_v61 }
 0x1d9   : > { %1981 = vmatmul.mubr.bf16.vlgmr.msra.gmra.mrb[8].mxu0 %v1137_v0 }
 0x1da   : > { %2020 = vmatprep.mubr.msk.bf16.mxu0 %vm2506_vm0, %v2505_v17  ;;  %2005 = vmatpush3.bf16.msra.mxu0 %v2229_v3 }
 0x1db   : > { %2006 = vmatprep.subr.bf16.mxu0 %v2505_v17 }
 0x1de   : > { %2007 = vmatpush3.bf16.msra.mxu0 %v2230_v4 }
 0x1df   : > { %2008 = vmatprep.subr.bf16.mxu0 %v2505_v17 }
 0x1e2   : > { %2009 = vmatpush3.bf16.msra.mxu0 %v2231_v5 }
 0x1e3   : > { %2010 = vmatprep.subr.bf16.mxu0 %v2505_v17 }
 0x1e6   : > { %2011 = vmatpush3.bf16.msra.mxu0 %v2232_v6 }
 0x1e7   : > { %2012 = vmatprep.subr.bf16.mxu0 %v2505_v17 }
 0x1ea   : > { %2013 = vmatpush3.bf16.msra.mxu0 %v2233_v7 }
 0x1eb   : > { %2014 = vmatprep.subr.bf16.mxu0 %v2505_v17 }
 0x1ee   : > { %2015 = vmatpush3.bf16.msra.mxu0 %v2234_v8 }
 0x1ef   : > { %2016 = vmatprep.subr.bf16.mxu0 %v2505_v17 }
 0x1f2   : > { %2017 = vmatpush3.bf16.msra.mxu0 %v2235_v20 }
 0x1f3   : > { %2018 = vmatprep.subr.bf16.mxu0 %v2505_v17 }
 0x1f6   : > { %2019 = vmatpush3.bf16.msra.mxu0 %v2236_v21 }
 0x2ac   : > { %v1227_v10 = vpop.f32.mrb[8].mxu0 }
 0x2ad   : > { %v1228_v11 = vadd.f32 %v1794_v9, %v1227_v10  ;;  %v1982_v12 = vpop.f32.mrb[9].mxu0 }
 0x2ae   : > { %v1230_v13 = vpop.f32.mrb[10].mxu0 }
 0x2af   : > { %v1231_v14 = vadd.f32 %v1794_v9, %v1230_v13  ;;  %v1983_v15 = vpop.f32.mrb[11].mxu0  ;;  %v1234_v16 = vmax.f32 %v1228_v11, 0.0 }
 0x2b1   : > { %v1235_v18 = vmax.f32 %v1231_v14, 0.0 }
 0x2b3   : > { %v1236_v19 = vpack.c.bf16 %v1235_v18, %v1234_v16 }
 0x2b5   : > { %2001 = vmatmul.mubr.bf16.vlgmr.msra.gmra.mrb[8].mxu1 %v1236_v19 }
 0x2b6   : > { %2040 = vmatprep.mubr.msk.bf16.mxu1 %vm2506_vm0, %v2505_v17  ;;  %2025 = vmatpush3.bf16.msra.mxu1 %v2237_v22 }
 0x2b7   : > { %2026 = vmatprep.subr.bf16.mxu1 %v2505_v17 }
 0x2ba   : > { %2027 = vmatpush3.bf16.msra.mxu1 %v2238_v23 }
 0x2bb   : > { %2028 = vmatprep.subr.bf16.mxu1 %v2505_v17 }
 0x2be   : > { %2029 = vmatpush3.bf16.msra.mxu1 %v2239_v24 }
 0x2bf   : > { %2030 = vmatprep.subr.bf16.mxu1 %v2505_v17 }
 0x2c2   : > { %2031 = vmatpush3.bf16.msra.mxu1 %v2240_v25 }
 0x2c3   : > { %2032 = vmatprep.subr.bf16.mxu1 %v2505_v17 }
 0x2c6   : > { %2033 = vmatpush3.bf16.msra.mxu1 %v2241_v26 }
 0x2c7   : > { %2034 = vmatprep.subr.bf16.mxu1 %v2505_v17 }
 0x2ca   : > { %2035 = vmatpush3.bf16.msra.mxu1 %v2242_v27 }
 0x2cb   : > { %2036 = vmatprep.subr.bf16.mxu1 %v2505_v17 }
 0x2ce   : > { %2037 = vmatpush3.bf16.msra.mxu1 %v2243_v36 }
 0x2cf   : > { %2038 = vmatprep.subr.bf16.mxu1 %v2505_v17  ;;  %v1821_v17 = vld [vmem:[%s2941_s2 + $0x4] ss:$0 sm:$0xff] }
 0x2d2   : > { %2039 = vmatpush3.bf16.msra.mxu1 %v2244_v37 }
 0x388   : > { %v1326_v29 = vpop.f32.mrb[8].mxu1 }
 0x389   : > { %v1327_v30 = vadd.f32 %v1803_v28, %v1326_v29  ;;  %v2002_v31 = vpop.f32.mrb[9].mxu1 }
 0x38a   : > { %v1329_v32 = vpop.f32.mrb[10].mxu1 }
 0x38b   : > { %1561 = vst [vmem:[%s2875_s16] sm:$0xff] %v1327_v30  ;;  %v1330_v33 = vadd.f32 %v1803_v28, %v1329_v32  ;;  %v2003_v34 = vpop.f32.mrb[11].mxu1 }
 0x38d   : > { %v1365_v35 = vpack.c.bf16 %v1330_v33, %v1327_v30  ;;  %1563 = vst [vmem:[%s2875_s16 + $0x10] sm:$0xff] %v1330_v33 }
 0x38f   : > { %2021 = vmatmul.mubr.bf16.vlgmr.msra.gmra.mrb[12].mxu0 %v1365_v35 }
 0x462   : > { %v1455_v39 = vpop.f32.mrb[12].mxu0 }
 0x463   : > { %v1456_v40 = vadd.f32 %v1812_v38, %v1455_v39  ;;  %v2022_v41 = vpop.f32.mrb[13].mxu0 }
 0x464   : > { %v1458_v42 = vpop.f32.mrb[14].mxu0 }
 0x465   : > { %v1459_v43 = vadd.f32 %v1812_v38, %v1458_v42  ;;  %v2023_v44 = vpop.f32.mrb[15].mxu0  ;;  %v1462_v45 = vmax.f32 %v1456_v40, 0.0 }
 0x467   : > { %v1463_v46 = vmax.f32 %v1459_v43, 0.0 }
 0x469   : > { %v1464_v47 = vpack.c.bf16 %v1463_v46, %v1462_v45 }
 0x46b   : > { %2041 = vmatmul.mubr.bf16.vlgmr.msra.gmra.mrb[12].mxu1 %v1464_v47 }
 0x53e   : > { %v1554_v48 = vpop.f32.mrb[12].mxu1 }
 0x53f   : > { %v1555_v49 = vadd.f32 %v1821_v17, %v1554_v48  ;;  %v2042_v50 = vpop.f32.mrb[13].mxu1 }
 0x540   : > { %v1557_v51 = vpop.f32.mrb[14].mxu1 }
 0x541   : > { %1562 = vst [vmem:[%s2875_s16 + $0x8] sm:$0xff] %v1555_v49  ;;  %v1558_v52 = vadd.f32 %v1821_v17, %v1557_v51  ;;  %v2043_v53 = vpop.f32.mrb[15].mxu1 }
 0x543   : > { %1564 = vst [vmem:[%s2875_s16 + $0x18] sm:$0xff] %v1558_v52 }
 0x544   : > { %2428 = shalt.err (!%p2425_p8)
}
 0x545   : > { %s2429_s16 = scalar_lea.hbm %s2893_s9, 512  ;;  %s2433_s21 = scalar_lea.hbm %s2946_s7, 1024 }
 0x546   : > { %p2430_p6 = scmp.ne.s32.totalorder %s2893_s9, %s2429_s16  ;;  %p2434_p3 = scmp.lt.u32.totalorder %s2893_s9, %s2946_s7 }
 0x547   : > { %p2435_p5 = scmp.lt.u32.totalorder %s2433_s21, %s2429_s16  ;;  %p2437_p7 = scmp.lt.u32.totalorder %s2429_s16, %s2893_s9 }
 0x548   : > { %p2431_p10 = pnand %p2430_p6, %p2965_p4 }
 0x549   : > { %p2436_p9 = por %p2435_p5, %p2434_p3 }
 0x54a   : > { %p2432_p11 = pneg %p2431_p10 }
 0x54b   : > { %p2438_p12 = por %p2437_p7, %p2436_p9 }
 0x54d   : > { %p2439_p1 = pnand %p2438_p12, %p2432_p11 }
 0x54f   : > { %2442 = shalt.err (!%p2439_p1)
}
 0x550   : > { %s2508_s10 = smov 256   ;;  %s2509_s30 = smov 16  }
 0x551   : > { %2066 = dma.vmem_to_hbm [thread:$0]  (%p2965_p4), %s2888_s20, 512, %s2893_s9, %s1566_s13, %s2508_s10, %s2508_s10, %s2509_s30  }
 0x552 PF: > { %s1595_s11 = sand.u32 1, %s2481_s24   ;;  %p2966_p13 = scmp.ne.s32.totalorder %s2956_s14, 0 }
 0x553   : > { %p2967_p0 = scmp.ge.s32.totalorder %s2493_s27, 2  ;;  %s1596_s22 = scalar_lea.sflag [#allocation4], %s1595_s11 }
 0x555   : > { %p2089_p2 = pnand %p2967_p0, %p2966_p13 }
 0x557   : > { %2476 = dma.done.wait (!%p2089_p2), %s1596_s22, 512  }
 0x558   : > { %2478 = vsyncadd (!%p2089_p2), %s1596_s22, 4294966784  ;;  %p23_p8 = scmp.ge.s32.totalorder %s2723_s19, 4   ;;  %s2968_s24 = smov %s2485_s25 }
 0x559   : > { %s2969_s25 = smov %s2489_s26  ;;  %s2970_s26 = smov %s2735_s12 }
 0x55a   : > { %s2971_s27 = smov %s2723_s19  ;;  %25 = sbr.rel (!%p23_p8) target bundleno = 8 (0x8), region = 113 }
 0x561   :  { %1601 = vsyncpa [#allocation3], 1 }
 0x562   :  { %1603 = vsyncpa [#allocation3 + $0x1], 1 }
 0x563   :  { %1604 = vsyncpa [#allocation6], 1 }
 0x564   :  { %1605 = vsyncpa [#allocation9], 1 }
 0x565   :  { %1606 = vsyncpa [#allocation12], 1 }
 0x566   :  { %1607 = vsyncpa [#allocation4], 1 }
 0x567   :  { %1609 = vsyncpa [#allocation4 + $0x1], 1 }

</bundles_post_ra>
